<compile_context>
chip_gen: v7x
topology: tpu7x:2x2x1
jax: 0.10.0
libtpu: 0.0.40
codegen_flags: <defaults>
</compile_context>

<pallas_src>
import functools

import jax
import jax.numpy as jnp
from jax.experimental import pallas as pl
from jax.experimental.pallas import tpu as pltpu


def _net_kernel(x_ref, wdT_ref, wsT_ref, b_ref, o_ref, *, act: str):
    # x_ref  : (TILE_B, NDENDS) f32, VMEM (tiled over batch)
    # wdT_ref: (NDENDS, 2)      f32, VMEM (resident across grid steps)
    # wsT_ref: (2, 1)           f32, VMEM (resident; soma_layer.weight^T)
    # b_ref  : (1,)             f32, SMEM (soma_layer.bias)
    # o_ref  : (TILE_B, 1)      f32, VMEM
    x = x_ref[...]

    # Dendritic layer on the MXU: (TILE_B, ND) @ (ND, 2) -> (TILE_B, 2).
    h = jnp.dot(x, wdT_ref[...], preferred_element_type=jnp.float32)
    h = jnp.maximum(h, 0.0)  # relu (VPU)

    if act == "sub":
        out = jnp.sqrt(h)  # EUP
    elif act == "supra":
        # sigmoid(h) = 1 / (1 + exp(-h)); exp on EUP, exact reciprocal.
        # (pl.reciprocal(..., approx=True) is a further small win if ~1e-4
        #  relative error is acceptable.)
        out = pl.reciprocal(1.0 + jnp.exp(-h), approx=False)
    else:
        out = h

    # Soma Linear(2, 1): second tiny MXU dot + scalar bias from SMEM.
    soma = jnp.dot(out, wsT_ref[...], preferred_element_type=jnp.float32)
    o_ref[...] = soma + b_ref[0]


def _round_up(x: int, m: int) -> int:
    return (x + m - 1) // m * m


def net_forward(x, dlayer_w, soma_w, soma_b, act="relu", tile_b=8192):
    """Pallas forward pass of Net.

    x        : (B, NDENDS) float32
    dlayer_w : (2, NDENDS) float32   (PyTorch nn.Linear layout)
    soma_w   : (1, 2)      float32
    soma_b   : (1,)        float32
    """
    if act == "mixed":
        raise NotImplementedError(
            "act='mixed' is buggy in the PyTorch source (undefined `o1`); "
            "not implemented."
        )

    B, nd = x.shape
    b_pad8 = _round_up(B, 8)

    # --- Tile sizing -------------------------------------------------------
    # Count the *padded* VMEM layout: the x block is lane-padded to a multiple
    # of 128 and the (tile_b, 1) output block also occupies 128 lanes; both
    # are double-buffered by the pipeline.  Budget 16 MiB of block data so the
    # kernel fits v7x's 32 MiB scoped / 64 MiB physical VMEM with headroom.
    x_lanes = max(128, _round_up(nd, 128))
    bytes_per_row = 2 * (x_lanes + 128) * 4          # double-buffered x + out
    vmem_block_budget = 16 * 1024 * 1024
    max_tile = max(8, (vmem_block_budget // bytes_per_row) // 8 * 8)

    tile_b = min(int(tile_b), max_tile, b_pad8)
    # Keep >= 2 balanced grid steps when possible so v7x's two TensorCores
    # both get work (dimension_semantics=("parallel",)).
    if b_pad8 >= 16:
        tile_b = min(tile_b, _round_up((b_pad8 + 1) // 2, 8))
    tile_b = max(8, _round_up(tile_b, 8))

    b_pad = _round_up(B, tile_b)
    if b_pad != B:
        # Padded rows are independent and sliced off after the call.
        x = jnp.pad(x, ((0, b_pad - B), (0, 0)))

    wdT = dlayer_w.T.astype(jnp.float32)             # (nd, 2)
    wsT = soma_w.reshape(1, 2).T.astype(jnp.float32)  # (2, 1)
    bias = soma_b.reshape(1).astype(jnp.float32)      # (1,) -> SMEM scalar

    n_trans = 2 * b_pad if act in ("sub", "supra") else 0
    cost = pl.CostEstimate(
        flops=2 * b_pad * nd * 2 + 2 * b_pad * 2 + b_pad,
        transcendentals=n_trans,
        bytes_accessed=b_pad * nd * 4 + b_pad * 4 + (nd * 2 + 2 + 1) * 4,
    )

    kernel = functools.partial(_net_kernel, act=act)
    out = pl.pallas_call(
        kernel,
        out_shape=jax.ShapeDtypeStruct((b_pad, 1), jnp.float32),
        grid_spec=pltpu.PrefetchScalarGridSpec(
            num_scalar_prefetch=0,
            grid=(b_pad // tile_b,),
            in_specs=[
                pl.BlockSpec((tile_b, nd), lambda i: (i, 0)),        # x tile
                pl.BlockSpec((nd, 2), lambda i: (0, 0)),             # W_d^T (resident)
                pl.BlockSpec((2, 1), lambda i: (0, 0)),              # W_s^T (resident)
                pl.BlockSpec(memory_space=pltpu.MemorySpace.SMEM),   # soma bias
            ],
            out_specs=pl.BlockSpec((tile_b, 1), lambda i: (i, 0)),
        ),
        compiler_params=pltpu.CompilerParams(
            dimension_semantics=("parallel",),
            vmem_limit_bytes=32 * 1024 * 1024,
        ),
        cost_estimate=cost,
    )(x, wdT, wsT, bias)

    return out[:B]


def _reference(x, dlayer_w, soma_w, soma_b, act="relu"):
    h = jnp.maximum(x @ dlayer_w.T, 0.0)
    if act == "sub":
        out = jnp.sqrt(h)
    elif act == "supra":
        out = jax.nn.sigmoid(h)
    else:
        out = h
    return out @ soma_w.T + soma_b[None, :]


if __name__ == "__main__":
    key = jax.random.PRNGKey(0)
    kx, kw1, kw2, kb = jax.random.split(key, 4)

    NDENDS = 16
    bound_d = 1.0 / (NDENDS ** 0.5)
    dlayer_w = jax.random.uniform(kw1, (2, NDENDS), jnp.float32, -bound_d, bound_d)
    bound_s = 1.0 / (2 ** 0.5)
    soma_w = jax.random.uniform(kw2, (1, 2), jnp.float32, -bound_s, bound_s)
    soma_b = jax.random.uniform(kb, (1,), jnp.float32, -bound_s, bound_s)

    ok = True
    x = None
    # A single-tile small case and a ragged multi-tile case (exercises the
    # padding + 2-step "parallel" grid path).
    for B, tb in ((8, 8192), (300, 8192)):
        kx_b = jax.random.fold_in(kx, B)
        x = jax.random.normal(kx_b, (B, NDENDS), dtype=jnp.float32)
        for act in ("relu", "sub", "supra"):
            out = jax.block_until_ready(
                net_forward(x, dlayer_w, soma_w, soma_b, act=act, tile_b=tb)
            )
            ref = _reference(x, dlayer_w, soma_w, soma_b, act=act)
            if out.shape != (B, 1):
                ok = False
            if not jnp.allclose(out, ref, atol=1e-5, rtol=1e-5):
                ok = False

    # 'mixed' must raise (intentionally unimplemented; buggy in source).
    try:
        net_forward(x, dlayer_w, soma_w, soma_b, act="mixed")
        ok = False
    except NotImplementedError:
        pass

    print("KERNEL_OK" if ok else "KERNEL_MISMATCH")
</pallas_src>

<mosaic_0001>
module attributes {stable_mosaic.version = 11 : i64} {
  func.func @_net_kernel(%arg0: i32, %arg1: memref<8x16xf32, #tpu.memory_space<vmem>>, %arg2: memref<16x2xf32, #tpu.memory_space<vmem>>, %arg3: memref<2x1xf32, #tpu.memory_space<vmem>>, %arg4: memref<1xf32, #tpu.memory_space<smem>>, %arg5: memref<8x1xf32, #tpu.memory_space<vmem>>) attributes {dimension_semantics = [#tpu.dimension_semantics<parallel>], iteration_bounds = array<i64: 1>, scalar_prefetch = 0 : i64, scratch_operands = 0 : i64, tpu.core_type = #tpu.core_type<tc>, window_params = [{transform_indices = @transform_0, window_bounds = array<i64: 8, 16>}, {pipeline_mode = #tpu.pipeline_mode<synchronous>, transform_indices = @transform_1, window_bounds = array<i64: 16, 2>}, {pipeline_mode = #tpu.pipeline_mode<synchronous>, transform_indices = @transform_2, window_bounds = array<i64: 2, 1>}, {transform_indices = @transform_3, window_bounds = array<i64: 1>}, {transform_indices = @transform_4, window_bounds = array<i64: 8, 1>}]} {
    %c0 = arith.constant 0 : index
    %c0_0 = arith.constant 0 : index
    %0 = vector.load %arg1[%c0, %c0_0] : memref<8x16xf32, #tpu.memory_space<vmem>>, vector<8x16xf32>
    %c0_1 = arith.constant 0 : index
    %c0_2 = arith.constant 0 : index
    %1 = vector.load %arg2[%c0_1, %c0_2] : memref<16x2xf32, #tpu.memory_space<vmem>>, vector<16x2xf32>
    %cst = arith.constant dense<0.000000e+00> : vector<8x2xf32>
    %2 = tpu.matmul %0, %1, %cst {dimension_numbers = #tpu.dot_dimension_numbers<[1], [0], [0], [1], [0, 0, 1, 1], [], []>} : vector<8x16xf32>, vector<16x2xf32>, vector<8x2xf32> -> vector<8x2xf32>
    %cst_3 = arith.constant 0.000000e+00 : f32
    %3 = vector.broadcast %cst_3 : f32 to vector<8x2xf32>
    %4 = arith.maximumf %2, %3 : vector<8x2xf32>
    %c0_4 = arith.constant 0 : index
    %c0_5 = arith.constant 0 : index
    %5 = vector.load %arg3[%c0_4, %c0_5] : memref<2x1xf32, #tpu.memory_space<vmem>>, vector<2x1xf32>
    %cst_6 = arith.constant dense<0.000000e+00> : vector<8x1xf32>
    %6 = tpu.matmul %4, %5, %cst_6 {dimension_numbers = #tpu.dot_dimension_numbers<[1], [0], [0], [1], [0, 0, 1, 1], [], []>} : vector<8x2xf32>, vector<2x1xf32>, vector<8x1xf32> -> vector<8x1xf32>
    %c0_7 = arith.constant 0 : index
    %7 = memref.load %arg4[%c0_7] : memref<1xf32, #tpu.memory_space<smem>>
    %8 = vector.broadcast %7 : f32 to vector<8x1xf32>
    %9 = arith.addf %6, %8 : vector<8x1xf32>
    %c0_8 = arith.constant 0 : index
    %c0_9 = arith.constant 0 : index
    %10 = vector.load %arg5[%c0_8, %c0_9] : memref<8x1xf32, #tpu.memory_space<vmem>>, vector<8x1xf32>
    tpu.vector_store %arg5[%c0_8, %c0_9], %9 {strides = array<i32>} : memref<8x1xf32, #tpu.memory_space<vmem>>, vector<8x1xf32>,
    return
  }
  func.func @transform_0(%arg0: i32) -> (i32, i32) {
    %c0_i32 = arith.constant 0 : i32
    %c0_i32_0 = arith.constant 0 : i32
    return %arg0, %c0_i32 : i32, i32
  }
  func.func @transform_1(%arg0: i32) -> (i32, i32) {
    %c0_i32 = arith.constant 0 : i32
    %c0_i32_0 = arith.constant 0 : i32
    %c0_i32_1 = arith.constant 0 : i32
    return %c0_i32, %c0_i32_0 : i32, i32
  }
  func.func @transform_2(%arg0: i32) -> (i32, i32) {
    %c0_i32 = arith.constant 0 : i32
    %c0_i32_0 = arith.constant 0 : i32
    %c0_i32_1 = arith.constant 0 : i32
    return %c0_i32, %c0_i32_0 : i32, i32
  }
  func.func @transform_3(%arg0: i32) -> i32 {
    %c0_i32 = arith.constant 0 : i32
    %c0_i32_0 = arith.constant 0 : i32
    return %c0_i32 : i32
  }
  func.func @transform_4(%arg0: i32) -> (i32, i32) {
    %c0_i32 = arith.constant 0 : i32
    %c0_i32_0 = arith.constant 0 : i32
    return %arg0, %c0_i32 : i32, i32
  }
}

</mosaic_0001>

<bundles_post_ra>
// kernel: tpu_custom_call.1
= control target key start
LH: loop header
LB: loop body
LE: loop exit
PB: predicated region body
PF: predicated region fallthrough
CT: control target
= control target key end

     0   :  { %v209_v0 = vmov 0.0|0.0   ;;  %vm210_vm0 = vmmov 0   ;;  %v211_v3 = vmov 0.0   ;;  %vm21_vm1 = vcmask 130048   ;;  %s255_s1 = inlined_call_operand.vmem [shape: f32[16,2], index: 1, kind: input, shape index: {}]   ;;  %s256_s0 = inlined_call_operand.vmem [shape: f32[8,16], index: 0, kind: input, shape index: {}]   ;;  %s257_s2 = inlined_call_operand.vmem [shape: f32[2,1], index: 2, kind: input, shape index: {}]   ;;  %s258_s3 = inlined_call_operand.<no memory space> [shape: f32[1], index: 3, kind: input, shape index: {}]   ;;  %s259_s4 = inlined_call_operand.vmem [shape: f32[8,1], index: 4, kind: output, shape index: {}]  }
   0x1   :  { %203 = vmatprep.subr.bf16.mxu0 %v209_v0  ;;  %v19_v1 = vld [vmem:[%s255_s1] sm:$0xff]  ;;  %v20_v2 = vld [vmem:[%s255_s1 + $0x8] sm:$0xff]  ;;  %195 = vmatprep.mubr.msk.f32.mxu0 %vm210_vm0, %v211_v3  ;;  %vm103_vm2 = vcmask 1041408   ;;  %vm99_vm3 = vcmask 15360   ;;  %v98_v10 = vstv %s258_s3  ;;  %vm177_vm4 = vcmask 7168  }
   0x2   :  { %v204_v4 = vpack.c.bf16 %v20_v2, %v19_v1  ;;  %198 = vmatprep.subr.mxu1 %v211_v3  ;;  %200 = vmatprep.mubr.msk.f32.mxu1 %vm210_vm0, %v211_v3  ;;  %v18_v5 = vld [vmem:[%s256_s0] sm:$0xff] }
   0x3   :  { %v96_v6 = vld [vmem:[%s257_s2] sm:$0x3] }
   0x4   :  { %205 = vmatpush3.bf16.msra.mxu0 %v204_v4  ;;  %199 = vmatpush3.msk.msra.mxu1 %vm103_vm2, %v96_v6 }
   0x7   :  { %196 = vmatmul.mubr.msk.f32.vlgmr.msra.gmra.mrb[0].mxu0 %vm21_vm1, %v18_v5 }
  0xda   :  { %v91_v7 = vpop.f32.mrb[0].mxu0 }
  0xdb   :  { %v95_v8 = vmax.f32 %v91_v7, 0.0  ;;  %v197_v9 = vpop.f32.mrb[1].mxu0 }
  0xdd   :  { %201 = vmatmul.mubr.msk.f32.vlgmr.msra.gmra.mrb[0].mxu1 %vm99_vm3, %v95_v8 }
 0x1b0   :  { %v173_v11 = vpop.f32.mrb[0].mxu1 }
 0x1b1   :  { %v174_v12 = vadd.f32 %v173_v11, %v98_v10  ;;  %v202_v13 = vpop.f32.mrb[1].mxu1 }
 0x1b3   :  { %178 = vst.msk [vmem:[%s259_s4] sm:$0xff] %vm177_vm4, %v174_v12 }

</bundles_post_ra>
